<compile_context>
chip_gen: v5e
topology: v5e:2x2
jax: 0.10.0
libtpu: 0.0.40
codegen_flags: <defaults>
</compile_context>

<pallas_src>
import functools

import jax
import jax.numpy as jnp
from jax.experimental import pallas as pl
from jax.experimental.pallas import tpu as pltpu

LANE = 128      # lane-dense padding for feature dims
SUBLANE = 8     # sublane granularity for the batch dim


def _round_up(x, m):
    return ((x + m - 1) // m) * m


# ---------------- fused Pallas kernel ----------------

def _fused_mlp_kernel(num_linear, in_features, out_features,
                      x_ref, w_ref, b_ref, alpha_ref, o_ref, *scratch):
    """One batch tile through the whole network, entirely in VMEM.

    x_ref:     (TILE_B, in_features)  f32   (pipelined per grid step)
    w_ref:     (L, LANE, LANE)        bf16/f32, zero-padded, VMEM-resident
    b_ref:     (L, 1, LANE)           f32,      zero-padded, VMEM-resident
    alpha_ref: (L - 1,)               f32 scalars in SMEM
    o_ref:     (TILE_B, out_features) f32
    scratch:   optional (TILE_B, LANE) f32 VMEM buffer used to zero-pad x.
    """
    if scratch:                                   # in_features < LANE
        pad_ref = scratch[0]
        pad_ref[...] = jnp.zeros_like(pad_ref)    # exact: pad cols stay zero
        pad_ref[:, :in_features] = x_ref[...]
        h = pad_ref[...]
    else:
        h = x_ref[...]

    for i in range(num_linear):                   # statically unrolled (small L)
        # MXU: bf16 x bf16 -> f32 accumulate; zero-padded rows/cols are exact.
        y = jnp.dot(h.astype(w_ref.dtype), w_ref[i],
                    preferred_element_type=jnp.float32)
        y = y + b_ref[i]                          # f32 bias add (VPU)
        if i < num_linear - 1:
            alpha = alpha_ref[i]                  # scalar PReLU slope from SMEM
            h = jnp.where(y > 0, y, alpha * y)    # PReLU in f32
        else:
            h = y

    # Write only the valid output columns (no wrapper-side slice launch).
    o_ref[...] = h[:, :out_features].astype(o_ref.dtype)


# ---------------- parameter preparation (one-time, hoisted) ----------------

def init_params(key, input_size, output_size, n, l):
    """PyTorch-default init: Linear W,b ~ U(-1/sqrt(fan_in), 1/sqrt(fan_in));
    PReLU alpha = 0.25 (num_parameters=1 per hidden activation)."""
    dims = [(input_size, n)] + [(n, n)] * (l - 1) + [(n, output_size)]
    weights, biases = [], []
    for fan_in, fan_out in dims:
        key, kw, kb = jax.random.split(key, 3)
        bound = 1.0 / jnp.sqrt(jnp.float32(fan_in))
        weights.append(
            jax.random.uniform(kw, (fan_in, fan_out), jnp.float32, -bound, bound))
        biases.append(
            jax.random.uniform(kb, (fan_out,), jnp.float32, -bound, bound))
    alphas = jnp.full((len(dims) - 1,), 0.25, dtype=jnp.float32)
    return weights, biases, alphas


def prepare_stacked_params(weights, biases, *, param_dtype=jnp.bfloat16):
    """Stack & zero-pad: weights -> (L, LANE, LANE) param_dtype,
    biases -> (L, 1, LANE) f32 (bias/PReLU math stays f32)."""
    num_linear = len(weights)
    w_stack = jnp.zeros((num_linear, LANE, LANE), param_dtype)
    b_stack = jnp.zeros((num_linear, 1, LANE), jnp.float32)
    for i, (w, b) in enumerate(zip(weights, biases)):
        k, no = w.shape
        w_stack = w_stack.at[i, :k, :no].set(w.astype(param_dtype))
        b_stack = b_stack.at[i, 0, :no].set(b.astype(jnp.float32))
    return w_stack, b_stack


# ---------------- wrapper ----------------

@functools.partial(jax.jit, static_argnames=("output_size", "tile_b"))
def fused_mlp(x, w_stack, b_stack, alphas, *, output_size, tile_b=None):
    batch, in_features = x.shape
    num_linear = w_stack.shape[0]
    # TODO(synk): generalize to feature dims > 128 (would need a K/N grid).
    assert in_features <= LANE and output_size <= LANE

    if tile_b is None:
        tile_b = min(512, _round_up(batch, SUBLANE))
    tile_b = max(SUBLANE,
                 _round_up(min(tile_b, _round_up(batch, SUBLANE)), SUBLANE))
    num_tiles = pl.cdiv(batch, tile_b)

    in_specs = [
        # x: pipelined batch tiles (last dim equals full array dim -> legal).
        pl.BlockSpec((tile_b, in_features), lambda i: (i, 0)),
        # weights / biases: constant index map -> VMEM-resident across steps.
        pl.BlockSpec((num_linear, LANE, LANE), lambda i: (0, 0, 0)),
        pl.BlockSpec((num_linear, 1, LANE), lambda i: (0, 0, 0)),
        # scalar PReLU slopes in SMEM.
        pl.BlockSpec(memory_space=pltpu.MemorySpace.SMEM),
    ]
    out_specs = pl.BlockSpec((tile_b, output_size), lambda i: (i, 0))

    needs_pad = in_features < LANE
    scratch_shapes = [pltpu.VMEM((tile_b, LANE), jnp.float32)] if needs_pad else []

    kernel = functools.partial(
        _fused_mlp_kernel, num_linear, in_features, output_size)

    return pl.pallas_call(
        kernel,
        grid=(num_tiles,),
        in_specs=in_specs,
        out_specs=out_specs,
        scratch_shapes=scratch_shapes,
        out_shape=jax.ShapeDtypeStruct((batch, output_size), jnp.float32),
        compiler_params=pltpu.CompilerParams(
            dimension_semantics=("parallel",)),   # megacore sharding on v7x
    )(x, w_stack, b_stack, alphas)


# ---------------- pure-JAX reference ----------------

def model_forward_ref(x, weights, biases, alphas, dot_dtype=jnp.float32):
    """Reference forward. dot_dtype=bf16 mirrors the kernel's MXU precision
    (bf16 operands, f32 accumulate, f32 bias/PReLU)."""
    h = x
    for i in range(len(weights)):
        y = jnp.dot(h.astype(dot_dtype), weights[i].astype(dot_dtype),
                    preferred_element_type=jnp.float32) + biases[i]
        if i < len(weights) - 1:
            h = jnp.where(y > 0, y, alphas[i] * y)
        else:
            h = y
    return h


if __name__ == "__main__":
    # Shapes consistent with the module:
    # Linear(input_size, n)+PReLU, (l-1) x [Linear(n, n)+PReLU], Linear(n, output_size)
    input_size, n, l, output_size = 32, 32, 3, 16

    key = jax.random.PRNGKey(0)
    key, kx_small, kx_big = jax.random.split(key, 3)
    weights, biases, alphas = init_params(key, input_size, output_size, n, l)

    # --- case 1: f32 params, tiny batch (matches the fp32 PyTorch module) ---
    x_small = jax.random.normal(kx_small, (8, input_size), dtype=jnp.float32)
    w_f32, b_f32 = prepare_stacked_params(weights, biases, param_dtype=jnp.float32)
    out_small = jax.block_until_ready(
        fused_mlp(x_small, w_f32, b_f32, alphas, output_size=output_size))
    ref_small = model_forward_ref(x_small, weights, biases, alphas)
    assert out_small.shape == (8, output_size)
    assert jnp.allclose(out_small, ref_small, atol=1e-5, rtol=1e-5), \
        f"f32 max abs err = {jnp.max(jnp.abs(out_small - ref_small))}"

    # --- case 2: bf16 params, batched grid (2 x 512-row tiles, parallel axis) ---
    x_big = jax.random.normal(kx_big, (1024, input_size), dtype=jnp.float32)
    w_bf16, b_bf16 = prepare_stacked_params(weights, biases, param_dtype=jnp.bfloat16)
    out_big = jax.block_until_ready(
        fused_mlp(x_big, w_bf16, b_bf16, alphas,
                  output_size=output_size, tile_b=512))
    ref_big = model_forward_ref(x_big, weights, biases, alphas,
                                dot_dtype=jnp.bfloat16)
    assert out_big.shape == (1024, output_size)
    assert jnp.allclose(out_big, ref_big, atol=1e-4, rtol=1e-4), \
        f"bf16 max abs err = {jnp.max(jnp.abs(out_big - ref_big))}"

    print("KERNEL_OK")
</pallas_src>

<mosaic_0001>
module attributes {stable_mosaic.version = 11 : i64} {
  func.func @_fused_mlp_kernel(%arg0: i32, %arg1: memref<8x32xf32, #tpu.memory_space<vmem>>, %arg2: memref<4x128x128xf32, #tpu.memory_space<vmem>>, %arg3: memref<4x1x128xf32, #tpu.memory_space<vmem>>, %arg4: memref<3xf32, #tpu.memory_space<smem>>, %arg5: memref<8x16xf32, #tpu.memory_space<vmem>>, %arg6: memref<8x128xf32, #tpu.memory_space<vmem>>) attributes {dimension_semantics = [#tpu.dimension_semantics<parallel>], iteration_bounds = array<i64: 1>, scalar_prefetch = 0 : i64, scratch_operands = 1 : i64, tpu.core_type = #tpu.core_type<tc>, window_params = [{transform_indices = @transform_0, window_bounds = array<i64: 8, 32>}, {pipeline_mode = #tpu.pipeline_mode<synchronous>, transform_indices = @transform_1, window_bounds = array<i64: 4, 128, 128>}, {pipeline_mode = #tpu.pipeline_mode<synchronous>, transform_indices = @transform_2, window_bounds = array<i64: 4, 1, 128>}, {transform_indices = @transform_3, window_bounds = array<i64: 3>}, {transform_indices = @transform_4, window_bounds = array<i64: 8, 16>}]} {
    %cst = arith.constant 0.000000e+00 : f32
    %0 = vector.broadcast %cst : f32 to vector<8x128xf32>
    %c0 = arith.constant 0 : index
    %c0_0 = arith.constant 0 : index
    %1 = vector.load %arg6[%c0, %c0_0] : memref<8x128xf32, #tpu.memory_space<vmem>>, vector<8x128xf32>
    tpu.vector_store %arg6[%c0, %c0_0], %0 {strides = array<i32>} : memref<8x128xf32, #tpu.memory_space<vmem>>, vector<8x128xf32>,
    %c0_1 = arith.constant 0 : index
    %c0_2 = arith.constant 0 : index
    %2 = vector.load %arg1[%c0_1, %c0_2] : memref<8x32xf32, #tpu.memory_space<vmem>>, vector<8x32xf32>
    %c0_3 = arith.constant 0 : index
    %c0_4 = arith.constant 0 : index
    %3 = vector.load %arg6[%c0_3, %c0_4] : memref<8x128xf32, #tpu.memory_space<vmem>>, vector<8x32xf32>
    tpu.vector_store %arg6[%c0_3, %c0_4], %2 {strides = array<i32>} : memref<8x128xf32, #tpu.memory_space<vmem>>, vector<8x32xf32>,
    %c0_5 = arith.constant 0 : index
    %c0_6 = arith.constant 0 : index
    %4 = vector.load %arg6[%c0_5, %c0_6] : memref<8x128xf32, #tpu.memory_space<vmem>>, vector<8x128xf32>
    %c0_7 = arith.constant 0 : index
    %c0_8 = arith.constant 0 : index
    %c0_9 = arith.constant 0 : index
    %5 = vector.load %arg2[%c0_7, %c0_8, %c0_9] : memref<4x128x128xf32, #tpu.memory_space<vmem>>, vector<1x128x128xf32>
    %6 = vector.shape_cast %5 : vector<1x128x128xf32> to vector<128x128xf32>
    %cst_10 = arith.constant dense<0.000000e+00> : vector<8x128xf32>
    %7 = tpu.matmul %4, %6, %cst_10 {dimension_numbers = #tpu.dot_dimension_numbers<[1], [0], [0], [1], [0, 0, 1, 1], [], []>} : vector<8x128xf32>, vector<128x128xf32>, vector<8x128xf32> -> vector<8x128xf32>
    %c0_11 = arith.constant 0 : index
    %c0_12 = arith.constant 0 : index
    %c0_13 = arith.constant 0 : index
    %8 = vector.load %arg3[%c0_11, %c0_12, %c0_13] : memref<4x1x128xf32, #tpu.memory_space<vmem>>, vector<1x1x128xf32>
    %9 = vector.shape_cast %8 : vector<1x1x128xf32> to vector<1x128xf32>
    %10 = vector.broadcast %9 : vector<1x128xf32> to vector<8x128xf32>
    %11 = arith.addf %7, %10 : vector<8x128xf32>
    %c0_14 = arith.constant 0 : index
    %12 = memref.load %arg4[%c0_14] : memref<3xf32, #tpu.memory_space<smem>>
    %cst_15 = arith.constant 0.000000e+00 : f32
    %13 = vector.broadcast %cst_15 : f32 to vector<8x128xf32>
    %14 = arith.cmpf ogt, %11, %13 : vector<8x128xf32>
    %15 = vector.broadcast %12 : f32 to vector<8x128xf32>
    %16 = arith.mulf %15, %11 : vector<8x128xf32>
    %17 = arith.select %14, %11, %16 : vector<8x128xi1>, vector<8x128xf32>
    %c1 = arith.constant 1 : index
    %c0_16 = arith.constant 0 : index
    %c0_17 = arith.constant 0 : index
    %18 = vector.load %arg2[%c1, %c0_16, %c0_17] : memref<4x128x128xf32, #tpu.memory_space<vmem>>, vector<1x128x128xf32>
    %19 = vector.shape_cast %18 : vector<1x128x128xf32> to vector<128x128xf32>
    %cst_18 = arith.constant dense<0.000000e+00> : vector<8x128xf32>
    %20 = tpu.matmul %17, %19, %cst_18 {dimension_numbers = #tpu.dot_dimension_numbers<[1], [0], [0], [1], [0, 0, 1, 1], [], []>} : vector<8x128xf32>, vector<128x128xf32>, vector<8x128xf32> -> vector<8x128xf32>
    %c1_19 = arith.constant 1 : index
    %c0_20 = arith.constant 0 : index
    %c0_21 = arith.constant 0 : index
    %21 = vector.load %arg3[%c1_19, %c0_20, %c0_21] : memref<4x1x128xf32, #tpu.memory_space<vmem>>, vector<1x1x128xf32>
    %22 = vector.shape_cast %21 : vector<1x1x128xf32> to vector<1x128xf32>
    %23 = vector.broadcast %22 : vector<1x128xf32> to vector<8x128xf32>
    %24 = arith.addf %20, %23 : vector<8x128xf32>
    %c1_22 = arith.constant 1 : index
    %25 = memref.load %arg4[%c1_22] : memref<3xf32, #tpu.memory_space<smem>>
    %cst_23 = arith.constant 0.000000e+00 : f32
    %26 = vector.broadcast %cst_23 : f32 to vector<8x128xf32>
    %27 = arith.cmpf ogt, %24, %26 : vector<8x128xf32>
    %28 = vector.broadcast %25 : f32 to vector<8x128xf32>
    %29 = arith.mulf %28, %24 : vector<8x128xf32>
    %30 = arith.select %27, %24, %29 : vector<8x128xi1>, vector<8x128xf32>
    %c2 = arith.constant 2 : index
    %c0_24 = arith.constant 0 : index
    %c0_25 = arith.constant 0 : index
    %31 = vector.load %arg2[%c2, %c0_24, %c0_25] : memref<4x128x128xf32, #tpu.memory_space<vmem>>, vector<1x128x128xf32>
    %32 = vector.shape_cast %31 : vector<1x128x128xf32> to vector<128x128xf32>
    %cst_26 = arith.constant dense<0.000000e+00> : vector<8x128xf32>
    %33 = tpu.matmul %30, %32, %cst_26 {dimension_numbers = #tpu.dot_dimension_numbers<[1], [0], [0], [1], [0, 0, 1, 1], [], []>} : vector<8x128xf32>, vector<128x128xf32>, vector<8x128xf32> -> vector<8x128xf32>
    %c2_27 = arith.constant 2 : index
    %c0_28 = arith.constant 0 : index
    %c0_29 = arith.constant 0 : index
    %34 = vector.load %arg3[%c2_27, %c0_28, %c0_29] : memref<4x1x128xf32, #tpu.memory_space<vmem>>, vector<1x1x128xf32>
    %35 = vector.shape_cast %34 : vector<1x1x128xf32> to vector<1x128xf32>
    %36 = vector.broadcast %35 : vector<1x128xf32> to vector<8x128xf32>
    %37 = arith.addf %33, %36 : vector<8x128xf32>
    %c2_30 = arith.constant 2 : index
    %38 = memref.load %arg4[%c2_30] : memref<3xf32, #tpu.memory_space<smem>>
    %cst_31 = arith.constant 0.000000e+00 : f32
    %39 = vector.broadcast %cst_31 : f32 to vector<8x128xf32>
    %40 = arith.cmpf ogt, %37, %39 : vector<8x128xf32>
    %41 = vector.broadcast %38 : f32 to vector<8x128xf32>
    %42 = arith.mulf %41, %37 : vector<8x128xf32>
    %43 = arith.select %40, %37, %42 : vector<8x128xi1>, vector<8x128xf32>
    %c3 = arith.constant 3 : index
    %c0_32 = arith.constant 0 : index
    %c0_33 = arith.constant 0 : index
    %44 = vector.load %arg2[%c3, %c0_32, %c0_33] : memref<4x128x128xf32, #tpu.memory_space<vmem>>, vector<1x128x128xf32>
    %45 = vector.shape_cast %44 : vector<1x128x128xf32> to vector<128x128xf32>
    %cst_34 = arith.constant dense<0.000000e+00> : vector<8x128xf32>
    %46 = tpu.matmul %43, %45, %cst_34 {dimension_numbers = #tpu.dot_dimension_numbers<[1], [0], [0], [1], [0, 0, 1, 1], [], []>} : vector<8x128xf32>, vector<128x128xf32>, vector<8x128xf32> -> vector<8x128xf32>
    %c3_35 = arith.constant 3 : index
    %c0_36 = arith.constant 0 : index
    %c0_37 = arith.constant 0 : index
    %47 = vector.load %arg3[%c3_35, %c0_36, %c0_37] : memref<4x1x128xf32, #tpu.memory_space<vmem>>, vector<1x1x128xf32>
    %48 = vector.shape_cast %47 : vector<1x1x128xf32> to vector<1x128xf32>
    %49 = vector.broadcast %48 : vector<1x128xf32> to vector<8x128xf32>
    %50 = arith.addf %46, %49 : vector<8x128xf32>
    %51 = vector.extract_strided_slice %50 {offsets = [0, 0], sizes = [8, 16], strides = [1, 1]} : vector<8x128xf32> to vector<8x16xf32>
    %c0_38 = arith.constant 0 : index
    %c0_39 = arith.constant 0 : index
    %52 = vector.load %arg5[%c0_38, %c0_39] : memref<8x16xf32, #tpu.memory_space<vmem>>, vector<8x16xf32>
    tpu.vector_store %arg5[%c0_38, %c0_39], %51 {strides = array<i32>} : memref<8x16xf32, #tpu.memory_space<vmem>>, vector<8x16xf32>,
    return
  }
  func.func @transform_0(%arg0: i32) -> (i32, i32) {
    %c0_i32 = arith.constant 0 : i32
    %c0_i32_0 = arith.constant 0 : i32
    return %arg0, %c0_i32 : i32, i32
  }
  func.func @transform_1(%arg0: i32) -> (i32, i32, i32) {
    %c0_i32 = arith.constant 0 : i32
    %c0_i32_0 = arith.constant 0 : i32
    %c0_i32_1 = arith.constant 0 : i32
    %c0_i32_2 = arith.constant 0 : i32
    return %c0_i32, %c0_i32_0, %c0_i32_1 : i32, i32, i32
  }
  func.func @transform_2(%arg0: i32) -> (i32, i32, i32) {
    %c0_i32 = arith.constant 0 : i32
    %c0_i32_0 = arith.constant 0 : i32
    %c0_i32_1 = arith.constant 0 : i32
    %c0_i32_2 = arith.constant 0 : i32
    return %c0_i32, %c0_i32_0, %c0_i32_1 : i32, i32, i32
  }
  func.func @transform_3(%arg0: i32) -> i32 {
    %c0_i32 = arith.constant 0 : i32
    %c0_i32_0 = arith.constant 0 : i32
    return %c0_i32 : i32
  }
  func.func @transform_4(%arg0: i32) -> (i32, i32) {
    %c0_i32 = arith.constant 0 : i32
    %c0_i32_0 = arith.constant 0 : i32
    return %arg0, %c0_i32 : i32, i32
  }
}

</mosaic_0001>

<bundles_post_ra>
// kernel: fused_mlp.1
= control target key start
LH: loop header
LB: loop body
LE: loop exit
PB: predicated region body
PF: predicated region fallthrough
CT: control target
= control target key end

     0   :  { %9 = vsyncpa [#allocation4], 0  ;;  %s465_s0 = inlined_call_operand.hbm [shape: f32[8,32], index: 0, kind: input, shape index: {}]   ;;  %s466_s1 = inlined_call_operand.hbm [shape: f32[4,128,128], index: 1, kind: input, shape index: {}]   ;;  %s467_s2 = inlined_call_operand.hbm [shape: f32[4,1,128], index: 2, kind: input, shape index: {}]   ;;  %s468_s3 = inlined_call_operand.vmem [shape: f32[3], index: 3, kind: input, shape index: {}]   ;;  %s469_s4 = inlined_call_operand.hbm [shape: f32[8,16], index: 4, kind: output, shape index: {}]  }
   0x1   :  { %10 = vsyncpa [#allocation8], 0 }
   0x2   :  { %11 = vsyncpa [#allocation6], 0  ;;  %s28_s17 = sshll.u32 %s466_s1, 4  ;;  %s29_s17 = int_to_ptr.hbm [resolvable:$true] %s28_s17 }
   0x3   :  { %12 = vsyncpa [#allocation5], 0  ;;  %s415_s18 = smov [#allocation7]   ;;  %s18_s22 = sshll.u32 %s465_s0, 4  ;;  %s19_s22 = int_to_ptr.hbm [resolvable:$true] %s18_s22 }
   0x4   :  { %s30_s19 = sshll.u32 %s415_s18, 4  ;;  %s416_s23 = smov 128   ;;  %s31_s19 = int_to_ptr.vmem [resolvable:$true] %s30_s19 }
   0x5   :  { %s417_s24 = smov 8   ;;  %s418_s25 = smov [#allocation3]  }
   0x6   :  { %36 = dma.hbm_to_vmem [thread:$0]  %s29_s17, 8192, %s31_s19, [#allocation8], %s416_s23, %s416_s23, %s417_s24  }
   0x7   :  { %s20_s26 = sshll.u32 %s418_s25, 4  ;;  %s41_s29 = sshll.u32 %s467_s2, 4  ;;  %s21_s26 = int_to_ptr.vmem [resolvable:$true] %s20_s26  ;;  %s42_s29 = int_to_ptr.hbm [resolvable:$true] %s41_s29 }
   0x8   :  { %23 = dma.hbm_to_vmem [thread:$0]  %s19_s22, 128, %s21_s26, [#allocation4]  }
   0x9   :  { %s419_s1 = smov [#allocation9]   ;;  %s55_s0 = sshll.u32 %s468_s3, 4  ;;  %s56_s0 = int_to_ptr.vmem [resolvable:$true] %s55_s0 }
   0xa   :  { %s43_s30 = sshll.u32 %s419_s1, 4  ;;  %s420_s7 = smov 16   ;;  %s44_s30 = int_to_ptr.vmem [resolvable:$true] %s43_s30 }
   0xb   :  { %s421_s8 = smov 1   ;;  %s422_s9 = smov [#allocation10]  }
   0xc   :  { %49 = dma.hbm_to_vmem [thread:$0]  %s42_s29, 64, %s44_s30, [#allocation8], %s420_s7, %s420_s7, %s421_s8  }
   0xd   :  { %58 = dma.vmem_to_smem %s56_s0, 16, %s422_s9, [#allocation6]  }
   0xe   :  { %407 = dma.done.wait [#allocation4], 128  }
   0xf   :  { %408 = vsyncadd [#allocation4], 4294967168 }
  0x10   :  { %409 = dma.done.wait [#allocation8], 8256  }
  0x11   :  { %410 = vsyncadd [#allocation8], 4294959040 }
  0x12   :  { %411 = dma.done.wait [#allocation6], 16  }
  0x13   :  { %412 = vsyncadd [#allocation6], 4294967280 }
  0x14   :  { %75 = sfence }
  0x15   :  { %v96_v0 = vld [vmem:[#allocation7 + $0x78] sm:$0xff]  ;;  %v95_v1 = vld [vmem:[#allocation7 + $0x70] sm:$0xff]  ;;  %v423_v2 = vmov 0.0   ;;  %v94_v3 = vld [vmem:[#allocation7 + $0x68] sm:$0xff]  ;;  %vm78_vm0 = vcmask 261120   ;;  %s121_s2 = sld [smem:[#allocation10]] }
  0x16   :  { %101 = vmatpush.msra.mxu0 %v96_v0  ;;  %76 = vst [vmem:[#allocation2] sm:$0xff] %v423_v2  ;;  %v93_v4 = vld [vmem:[#allocation7 + $0x60] sm:$0xff]  ;;  %v77_v5 = vld [vmem:[#allocation3] sm:$0xff]  ;;  %v141_v8 = vld [vmem:[#allocation7 + $0xf0] sm:$0xff]  ;;  %s283_s3 = sld [smem:[#allocation10 + $0x1]]  ;;  %s424_s11 = smov [#allocation11]  }
  0x17   :  { %v142_v6 = vld [vmem:[#allocation7 + $0xf8] sm:$0xff]  ;;  %79 = vst.msk [vmem:[#allocation2] sm:$0xff] %vm78_vm0, %v77_v5  ;;  %v140_v9 = vld [vmem:[#allocation7 + $0xe8] sm:$0xff]  ;;  %v91_v10 = vld [vmem:[#allocation7 + $0x50] sm:$0xff]  ;;  %s284_s10 = sld [smem:[#allocation10 + $0x2]]  ;;  %s269_s12 = sshll.u32 %s424_s11, 4  ;;  %s270_s12 = int_to_ptr.vmem [resolvable:$true] %s269_s12 }
  0x18   :  { %102 = vmatpush.msra.mxu0 %v95_v1  ;;  %v92_v7 = vld [vmem:[#allocation7 + $0x58] sm:$0xff]  ;;  %148 = vmatpush.msra.mxu1 %v142_v6  ;;  %v139_v11 = vld [vmem:[#allocation7 + $0xe0] sm:$0xff]  ;;  %v90_v12 = vld [vmem:[#allocation7 + $0x48] sm:$0xff]  ;;  %s271_s15 = sshll.u32 %s469_s4, 4  ;;  %vm262_vm4 = vcmask 130048   ;;  %s272_s15 = int_to_ptr.hbm [resolvable:$true] %s271_s15 }
  0x19   :  { %v138_v13 = vld [vmem:[#allocation7 + $0xd8] sm:$0xff]  ;;  %v89_v14 = vld [vmem:[#allocation7 + $0x40] sm:$0xff]  ;;  %v137_v15 = vld [vmem:[#allocation7 + $0xd0] sm:$0xff] }
  0x1a   :  { %103 = vmatpush.msra.mxu0 %v94_v3  ;;  %149 = vmatpush.msra.mxu1 %v141_v8  ;;  %v88_v16 = vld [vmem:[#allocation7 + $0x38] sm:$0xff]  ;;  %v136_v17 = vld [vmem:[#allocation7 + $0xc8] sm:$0xff]  ;;  %v87_v18 = vld [vmem:[#allocation7 + $0x30] sm:$0xff] }
  0x1b   :  { %v135_v19 = vld [vmem:[#allocation7 + $0xc0] sm:$0xff]  ;;  %v86_v20 = vld [vmem:[#allocation7 + $0x28] sm:$0xff]  ;;  %v134_v21 = vld [vmem:[#allocation7 + $0xb8] sm:$0xff]  ;;  %v123_v50 = vstv %s121_s2 }
  0x1c   :  { %104 = vmatpush.msra.mxu0 %v93_v4  ;;  %150 = vmatpush.msra.mxu1 %v140_v9  ;;  %v85_v22 = vld [vmem:[#allocation7 + $0x20] sm:$0xff]  ;;  %v133_v23 = vld [vmem:[#allocation7 + $0xb0] sm:$0xff]  ;;  %v84_v24 = vld [vmem:[#allocation7 + $0x18] sm:$0xff]  ;;  %v170_v8 = vstv %s283_s3 }
  0x1d   :  { %v132_v25 = vld [vmem:[#allocation7 + $0xa8] sm:$0xff]  ;;  %v83_v26 = vld [vmem:[#allocation7 + $0x10] sm:$0xff]  ;;  %v131_v27 = vld [vmem:[#allocation7 + $0xa0] sm:$0xff] }
  0x1e   :  { %105 = vmatpush.msra.mxu0 %v92_v7  ;;  %151 = vmatpush.msra.mxu1 %v139_v11  ;;  %v82_v28 = vld [vmem:[#allocation7 + $0x8] sm:$0xff]  ;;  %v130_v29 = vld [vmem:[#allocation7 + $0x98] sm:$0xff]  ;;  %v81_v30 = vld [vmem:[#allocation7] sm:$0xff] }
  0x1f   :  { %v80_v31 = vld [vmem:[#allocation2] sm:$0xff]  ;;  %v128_v33 = vld [vmem:[#allocation7 + $0x88] sm:$0xff]  ;;  %v127_v34 = vld [vmem:[#allocation7 + $0x80] sm:$0xff] }
  0x20   :  { %106 = vmatpush.msra.mxu0 %v91_v10  ;;  %152 = vmatpush.msra.mxu1 %v138_v13  ;;  %v129_v32 = vld [vmem:[#allocation7 + $0x90] sm:$0xff]  ;;  %v189_v35 = vld [vmem:[#allocation7 + $0x178] sm:$0xff]  ;;  %v187_v37 = vld [vmem:[#allocation7 + $0x168] sm:$0xff] }
  0x21   :  { %v188_v36 = vld [vmem:[#allocation7 + $0x170] sm:$0xff]  ;;  %195 = vmatpush.msra.mxu2 %v189_v35  ;;  %v186_v38 = vld [vmem:[#allocation7 + $0x160] sm:$0xff]  ;;  %v185_v39 = vld [vmem:[#allocation7 + $0x158] sm:$0xff] }
  0x22   :  { %107 = vmatpush.msra.mxu0 %v90_v12  ;;  %153 = vmatpush.msra.mxu1 %v137_v15  ;;  %v184_v40 = vld [vmem:[#allocation7 + $0x150] sm:$0xff]  ;;  %v183_v41 = vld [vmem:[#allocation7 + $0x148] sm:$0xff]  ;;  %v182_v42 = vld [vmem:[#allocation7 + $0x140] sm:$0xff] }
  0x23   :  { %196 = vmatpush.msra.mxu2 %v188_v36  ;;  %v181_v43 = vld [vmem:[#allocation7 + $0x138] sm:$0xff]  ;;  %v180_v44 = vld [vmem:[#allocation7 + $0x130] sm:$0xff]  ;;  %v179_v45 = vld [vmem:[#allocation7 + $0x128] sm:$0xff] }
  0x24   :  { %108 = vmatpush.msra.mxu0 %v89_v14  ;;  %154 = vmatpush.msra.mxu1 %v136_v17  ;;  %v178_v46 = vld [vmem:[#allocation7 + $0x120] sm:$0xff]  ;;  %v177_v47 = vld [vmem:[#allocation7 + $0x118] sm:$0xff]  ;;  %v176_v54 = vld [vmem:[#allocation7 + $0x110] sm:$0xff]  ;;  %v217_v17 = vstv %s284_s10 }
  0x25   :  { %197 = vmatpush.msra.mxu2 %v187_v37  ;;  %v295_v48 = vld [vmem:[#allocation9] ss:$0 sm:$0xff]  ;;  %v175_v55 = vld [vmem:[#allocation7 + $0x108] sm:$0xff]  ;;  %v236_v57 = vld [vmem:[#allocation7 + $0x1f8] sm:$0xff] }
  0x26   :  { %109 = vmatpush.msra.mxu0 %v88_v16  ;;  %155 = vmatpush.msra.mxu1 %v135_v19  ;;  %v174_v56 = vld [vmem:[#allocation7 + $0x100] sm:$0xff]  ;;  %v235_v58 = vld [vmem:[#allocation7 + $0x1f0] sm:$0xff]  ;;  %v234_v59 = vld [vmem:[#allocation7 + $0x1e8] sm:$0xff] }
  0x27   :  { %198 = vmatpush.msra.mxu2 %v186_v38  ;;  %242 = vmatpush.msra.mxu3 %v236_v57  ;;  %v233_v60 = vld [vmem:[#allocation7 + $0x1e0] sm:$0xff]  ;;  %v232_v61 = vld [vmem:[#allocation7 + $0x1d8] sm:$0xff]  ;;  %v231_v62 = vld [vmem:[#allocation7 + $0x1d0] sm:$0xff] }
  0x28   :  { %110 = vmatpush.msra.mxu0 %v87_v18  ;;  %156 = vmatpush.msra.mxu1 %v134_v21  ;;  %v230_v63 = vld [vmem:[#allocation7 + $0x1c8] sm:$0xff]  ;;  %v229_v0 = vld [vmem:[#allocation7 + $0x1c0] sm:$0xff]  ;;  %v228_v1 = vld [vmem:[#allocation7 + $0x1b8] sm:$0xff] }
  0x29   :  { %199 = vmatpush.msra.mxu2 %v185_v39  ;;  %243 = vmatpush.msra.mxu3 %v235_v58  ;;  %v227_v2 = vld [vmem:[#allocation7 + $0x1b0] sm:$0xff]  ;;  %v226_v3 = vld [vmem:[#allocation7 + $0x1a8] sm:$0xff]  ;;  %v225_v4 = vld [vmem:[#allocation7 + $0x1a0] sm:$0xff] }
  0x2a   :  { %111 = vmatpush.msra.mxu0 %v86_v20  ;;  %157 = vmatpush.msra.mxu1 %v133_v23  ;;  %v224_v5 = vld [vmem:[#allocation7 + $0x198] sm:$0xff]  ;;  %v296_v6 = vld [vmem:[#allocation9 + $0x1] ss:$0 sm:$0xff]  ;;  %v223_v12 = vld [vmem:[#allocation7 + $0x190] sm:$0xff] }
  0x2b   :  { %200 = vmatpush.msra.mxu2 %v184_v40  ;;  %244 = vmatpush.msra.mxu3 %v234_v59  ;;  %v222_v13 = vld [vmem:[#allocation7 + $0x188] sm:$0xff]  ;;  %v221_v14 = vld [vmem:[#allocation7 + $0x180] sm:$0xff] }
  0x2c   :  { %112 = vmatpush.msra.mxu0 %v85_v22  ;;  %158 = vmatpush.msra.mxu1 %v132_v25  ;;  %v297_v15 = vld [vmem:[#allocation9 + $0x2] ss:$0 sm:$0xff]  ;;  %v298_v21 = vld [vmem:[#allocation9 + $0x3] ss:$0 sm:$0xff] }
  0x2d   :  { %201 = vmatpush.msra.mxu2 %v183_v41  ;;  %245 = vmatpush.msra.mxu3 %v233_v60 }
  0x2e   :  { %113 = vmatpush.msra.mxu0 %v84_v24  ;;  %159 = vmatpush.msra.mxu1 %v131_v27 }
  0x2f   :  { %202 = vmatpush.msra.mxu2 %v182_v42  ;;  %246 = vmatpush.msra.mxu3 %v232_v61 }
  0x30   :  { %114 = vmatpush.msra.mxu0 %v83_v26  ;;  %160 = vmatpush.msra.mxu1 %v130_v29 }
  0x31   :  { %203 = vmatpush.msra.mxu2 %v181_v43  ;;  %247 = vmatpush.msra.mxu3 %v231_v62 }
  0x32   :  { %115 = vmatpush.msra.mxu0 %v82_v28  ;;  %161 = vmatpush.msra.mxu1 %v129_v32 }
  0x33   :  { %204 = vmatpush.msra.mxu2 %v180_v44  ;;  %248 = vmatpush.msra.mxu3 %v230_v63 }
  0x34   :  { %116 = vmatpush.msra.mxu0 %v81_v30  ;;  %162 = vmatpush.msra.mxu1 %v128_v33 }
  0x35   :  { %117 = vmatmul.f32.vlgmr.msra.gmra.mxu0 %v80_v31  ;;  %205 = vmatpush.msra.mxu2 %v179_v45 }
  0x36   :  { %163 = vmatpush.msra.mxu1 %v127_v34  ;;  %249 = vmatpush.msra.mxu3 %v229_v0 }
  0x37   :  { %206 = vmatpush.msra.mxu2 %v178_v46 }
  0x38   :  { %250 = vmatpush.msra.mxu3 %v228_v1 }
  0x39   :  { %207 = vmatpush.msra.mxu2 %v177_v47 }
  0x3a   :  { %251 = vmatpush.msra.mxu3 %v227_v2 }
  0x3b   :  { %208 = vmatpush.msra.mxu2 %v176_v54 }
  0x3c   :  { %252 = vmatpush.msra.mxu3 %v226_v3 }
  0x3d   :  { %209 = vmatpush.msra.mxu2 %v175_v55 }
  0x3e   :  { %253 = vmatpush.msra.mxu3 %v225_v4 }
  0x3f   :  { %210 = vmatpush.msra.mxu2 %v174_v56 }
  0x40   :  { %254 = vmatpush.msra.mxu3 %v224_v5 }
  0x42   :  { %255 = vmatpush.msra.mxu3 %v223_v12 }
  0x44   :  { %256 = vmatpush.msra.mxu3 %v222_v13 }
  0x46   :  { %257 = vmatpush.msra.mxu3 %v221_v14 }
  0xb2   :  { %v118_v49 = vpop.f32.mrf.mxu0 }
  0xb3   :  { %v119_v51 = vadd.f32 %v295_v48, %v118_v49 }
  0xb5   :  { %vm122_vm1 = vcmp.gt.f32.partialorder %v119_v51, 0.0  ;;  %v124_v52 = vmul.f32 %v123_v50, %v119_v51 }
  0xb7   :  { %v125_v53 = vsel %vm122_vm1, %v119_v51, %v124_v52 }
  0xb8   :  { %164 = vmatmul.f32.vlgmr.msra.gmra.mxu1 %v125_v53 }
 0x135   :  { %v165_v7 = vpop.f32.mrf.mxu1 }
 0x136   :  { %v166_v9 = vadd.f32 %v296_v6, %v165_v7 }
 0x138   :  { %vm169_vm2 = vcmp.gt.f32.partialorder %v166_v9, 0.0  ;;  %v171_v10 = vmul.f32 %v170_v8, %v166_v9 }
 0x13a   :  { %v172_v11 = vsel %vm169_vm2, %v166_v9, %v171_v10 }
 0x13b   :  { %211 = vmatmul.f32.vlgmr.msra.gmra.mxu2 %v172_v11 }
 0x1be   :  { %v212_v16 = vpop.f32.mrf.mxu2 }
 0x1bf   :  { %v213_v18 = vadd.f32 %v297_v15, %v212_v16 }
 0x1c1   :  { %vm216_vm3 = vcmp.gt.f32.partialorder %v213_v18, 0.0  ;;  %v218_v19 = vmul.f32 %v217_v17, %v213_v18 }
 0x1c3   :  { %v219_v20 = vsel %vm216_vm3, %v213_v18, %v218_v19 }
 0x1c4   :  { %258 = vmatmul.f32.vlgmr.msra.gmra.mxu3 %v219_v20 }
 0x247   :  { %v259_v22 = vpop.f32.mrf.mxu3 }
 0x248   :  { %v260_v23 = vadd.f32 %v298_v21, %v259_v22 }
 0x24a   :  { %263 = vst.msk [vmem:[#allocation11] sm:$0xff] %vm262_vm4, %v260_v23 }
 0x24b   :  { %274 = dma.vmem_to_hbm [thread:$0]  %s270_s12, 128, %s272_s15, [#allocation5]  }
 0x24c   :  { %413 = dma.done.wait [#allocation5], 128  }
 0x24d   :  { %414 = vsyncadd [#allocation5], 4294967168 }
 0x24e   :  { %279 = vsyncpa [#allocation4], 1 }
 0x24f   :  { %280 = vsyncpa [#allocation8], 1 }
 0x250   :  { %281 = vsyncpa [#allocation5], 1 }
 0x251   :  { %282 = vsyncpa [#allocation6], 1 }

</bundles_post_ra>
